<compile_context>
chip_gen: v7x
topology: tpu7x:2x2x1
jax: 0.10.0
libtpu: 0.0.40
codegen_flags: <defaults>
</compile_context>

<pallas_src>
import jax
import jax.numpy as jnp
from jax.experimental import pallas as pl
from jax.experimental.pallas import tpu as pltpu


def _round_up(n, m):
    return ((n + m - 1) // m) * m


def _value_net_kernel(x_ref, w1_ref, b1_ref, w2_ref, b2_ref, w3_ref, b3_ref,
                      out_ref):
    # x_ref:   (TB, D_in)  bf16  -- streamed per grid step
    # w1_ref:  (D_in, H)   bf16  -- VMEM-resident (constant index map)
    # b1_ref:  (1, H)      f32
    # w2_ref:  (H, H)      bf16
    # b2_ref:  (1, H)      f32
    # w3_ref:  (1, H)      bf16  -- final layer weight as a row
    # b3_ref:  (1, 1)      f32   -- scalar in SMEM
    # out_ref: (1, TB)     f32   -- lane-dense output slab
    x = x_ref[...]

    h1 = jnp.dot(x, w1_ref[...], preferred_element_type=jnp.float32)
    h1 = jnp.maximum(h1 + b1_ref[...], 0.0)                      # (TB, H) f32

    h2 = jnp.dot(h1.astype(w2_ref.dtype), w2_ref[...],
                 preferred_element_type=jnp.float32)
    h2 = jnp.maximum(h2 + b2_ref[...], 0.0)                      # (TB, H) f32

    # N=1 output column: an MXU matmul would be padded 128/256-wide; do it on
    # the VPU (elementwise mul) + XLU (lane reduce) instead.
    w3_row = w3_ref[...].astype(jnp.float32)                     # (1, H)
    v = jnp.sum(h2 * w3_row, axis=-1, keepdims=True)             # (TB, 1)
    v = v + b3_ref[0, 0]

    # Lane-dense store: (1, TB) rather than (TB, 1).
    out_ref[...] = jnp.transpose(v).astype(out_ref.dtype)


def value_network_forward(x, params, *, block_rows=512):
    """x: (B, input_size) float32 -> (B,) float32."""
    w1, b1, w2, b2, w3, b3 = params
    B, D = x.shape

    # Batch tile: large enough to pipeline HBM streaming against compute,
    # small enough to stay well inside v7x's 64 MiB VMEM.
    TB = block_rows if B >= block_rows else _round_up(B, 8)
    B_pad = _round_up(B, TB)
    if B_pad != B:
        x = jnp.pad(x, ((0, B_pad - B), (0, 0)))
    n_blocks = B_pad // TB

    # bf16 inputs/weights halve HBM traffic; accumulation is f32 on the MXU.
    x_bf = x.astype(jnp.bfloat16)
    w1_bf = w1.astype(jnp.bfloat16)
    w2_bf = w2.astype(jnp.bfloat16)
    w3_bf = jnp.transpose(w3).astype(jnp.bfloat16)      # (1, H) row
    b3_s = b3.reshape(1, 1).astype(jnp.float32)         # lone scalar -> SMEM

    const = lambda shape: pl.BlockSpec(shape, lambda i: (0, 0))

    out = pl.pallas_call(
        _value_net_kernel,
        out_shape=jax.ShapeDtypeStruct((1, B_pad), jnp.float32),
        grid=(n_blocks,),
        in_specs=[
            pl.BlockSpec((TB, D), lambda i: (i, 0)),             # x: streamed
            const(w1_bf.shape), const(b1.shape),                 # resident
            const(w2_bf.shape), const(b2.shape),
            const(w3_bf.shape),
            pl.BlockSpec(memory_space=pltpu.MemorySpace.SMEM),   # b3 scalar
        ],
        out_specs=pl.BlockSpec((1, TB), lambda i: (0, i)),
        compiler_params=pltpu.CompilerParams(
            dimension_semantics=("parallel",),   # shard batch tiles across TCs (v7x)
        ),
    )(x_bf, w1_bf, b1, w2_bf, b2, w3_bf, b3_s)

    return out[0, :B]


def init_params(key, input_size, hidden_size):
    """Xavier-uniform weights, zero biases (matches the PyTorch __init__)."""
    def xavier(k, fan_in, fan_out):
        bound = jnp.sqrt(6.0 / (fan_in + fan_out))
        # stored as (in, out): forward computes x @ W (== x @ W_pt.T + b)
        return jax.random.uniform(k, (fan_in, fan_out), jnp.float32,
                                  minval=-bound, maxval=bound)

    k1, k2, k3 = jax.random.split(key, 3)
    w1 = xavier(k1, input_size, hidden_size)
    b1 = jnp.zeros((1, hidden_size), jnp.float32)
    w2 = xavier(k2, hidden_size, hidden_size)
    b2 = jnp.zeros((1, hidden_size), jnp.float32)
    w3 = xavier(k3, hidden_size, 1)
    b3 = jnp.zeros((1, 1), jnp.float32)
    return (w1, b1, w2, b2, w3, b3)


def _ref_forward(x, params):
    """Pure-JAX f32 reference of the original PyTorch forward."""
    w1, b1, w2, b2, w3, b3 = params
    h = jnp.maximum(x @ w1 + b1, 0.0)
    h = jnp.maximum(h @ w2 + b2, 0.0)
    return (h @ w3 + b3).squeeze(-1)


if __name__ == "__main__":
    key = jax.random.PRNGKey(0)
    k_x, k_p = jax.random.split(key)

    batch, input_size, hidden_size = 8, 16, 32
    x = jax.random.normal(k_x, (batch, input_size), jnp.float32)
    params = init_params(k_p, input_size, hidden_size)

    out = value_network_forward(x, params)
    jax.block_until_ready(out)

    ref = _ref_forward(x, params)
    assert out.shape == (batch,)
    # Loose tolerance: inputs/weights are cast to bf16 inside the wrapper.
    assert jnp.allclose(out, ref, atol=1e-1, rtol=1e-1), (out, ref)

    # Larger, non-multiple-of-tile batch exercises the tiled grid + padding path.
    x_big = jax.random.normal(jax.random.PRNGKey(1), (1000, input_size),
                              jnp.float32)
    out_big = value_network_forward(x_big, params)
    jax.block_until_ready(out_big)
    ref_big = _ref_forward(x_big, params)
    assert out_big.shape == (1000,)
    assert jnp.allclose(out_big, ref_big, atol=1e-1, rtol=1e-1)

    print("KERNEL_OK")
</pallas_src>

<mosaic_0001>
module attributes {stable_mosaic.version = 11 : i64} {
  func.func @_value_net_kernel(%arg0: i32, %arg1: memref<8x16xbf16, #tpu.memory_space<vmem>>, %arg2: memref<16x32xbf16, #tpu.memory_space<vmem>>, %arg3: memref<1x32xf32, #tpu.memory_space<vmem>>, %arg4: memref<32x32xbf16, #tpu.memory_space<vmem>>, %arg5: memref<1x32xf32, #tpu.memory_space<vmem>>, %arg6: memref<1x32xbf16, #tpu.memory_space<vmem>>, %arg7: memref<1x1xf32, #tpu.memory_space<smem>>, %arg8: memref<1x8xf32, #tpu.memory_space<vmem>>) attributes {dimension_semantics = [#tpu.dimension_semantics<parallel>], iteration_bounds = array<i64: 1>, scalar_prefetch = 0 : i64, scratch_operands = 0 : i64, tpu.core_type = #tpu.core_type<tc>, window_params = [{transform_indices = @transform_0, window_bounds = array<i64: 8, 16>}, {pipeline_mode = #tpu.pipeline_mode<synchronous>, transform_indices = @transform_1, window_bounds = array<i64: 16, 32>}, {pipeline_mode = #tpu.pipeline_mode<synchronous>, transform_indices = @transform_2, window_bounds = array<i64: 1, 32>}, {pipeline_mode = #tpu.pipeline_mode<synchronous>, transform_indices = @transform_3, window_bounds = array<i64: 32, 32>}, {pipeline_mode = #tpu.pipeline_mode<synchronous>, transform_indices = @transform_4, window_bounds = array<i64: 1, 32>}, {pipeline_mode = #tpu.pipeline_mode<synchronous>, transform_indices = @transform_5, window_bounds = array<i64: 1, 32>}, {transform_indices = @transform_6, window_bounds = array<i64: 1, 1>}, {transform_indices = @transform_7, window_bounds = array<i64: 1, 8>}]} {
    %c0 = arith.constant 0 : index
    %c0_0 = arith.constant 0 : index
    %0 = vector.load %arg1[%c0, %c0_0] : memref<8x16xbf16, #tpu.memory_space<vmem>>, vector<8x16xbf16>
    %c0_1 = arith.constant 0 : index
    %c0_2 = arith.constant 0 : index
    %1 = vector.load %arg2[%c0_1, %c0_2] : memref<16x32xbf16, #tpu.memory_space<vmem>>, vector<16x32xbf16>
    %cst = arith.constant dense<0.000000e+00> : vector<8x32xf32>
    %2 = tpu.matmul %0, %1, %cst {dimension_numbers = #tpu.dot_dimension_numbers<[1], [0], [0], [1], [0, 0, 1, 1], [], []>} : vector<8x16xbf16>, vector<16x32xbf16>, vector<8x32xf32> -> vector<8x32xf32>
    %c0_3 = arith.constant 0 : index
    %c0_4 = arith.constant 0 : index
    %3 = vector.load %arg3[%c0_3, %c0_4] : memref<1x32xf32, #tpu.memory_space<vmem>>, vector<1x32xf32>
    %4 = vector.broadcast %3 : vector<1x32xf32> to vector<8x32xf32>
    %5 = arith.addf %2, %4 : vector<8x32xf32>
    %cst_5 = arith.constant 0.000000e+00 : f32
    %6 = vector.broadcast %cst_5 : f32 to vector<8x32xf32>
    %7 = arith.maximumf %5, %6 : vector<8x32xf32>
    %8 = arith.truncf %7 : vector<8x32xf32> to vector<8x32xbf16>
    %c0_6 = arith.constant 0 : index
    %c0_7 = arith.constant 0 : index
    %9 = vector.load %arg4[%c0_6, %c0_7] : memref<32x32xbf16, #tpu.memory_space<vmem>>, vector<32x32xbf16>
    %cst_8 = arith.constant dense<0.000000e+00> : vector<8x32xf32>
    %10 = tpu.matmul %8, %9, %cst_8 {dimension_numbers = #tpu.dot_dimension_numbers<[1], [0], [0], [1], [0, 0, 1, 1], [], []>} : vector<8x32xbf16>, vector<32x32xbf16>, vector<8x32xf32> -> vector<8x32xf32>
    %c0_9 = arith.constant 0 : index
    %c0_10 = arith.constant 0 : index
    %11 = vector.load %arg5[%c0_9, %c0_10] : memref<1x32xf32, #tpu.memory_space<vmem>>, vector<1x32xf32>
    %12 = vector.broadcast %11 : vector<1x32xf32> to vector<8x32xf32>
    %13 = arith.addf %10, %12 : vector<8x32xf32>
    %cst_11 = arith.constant 0.000000e+00 : f32
    %14 = vector.broadcast %cst_11 : f32 to vector<8x32xf32>
    %15 = arith.maximumf %13, %14 : vector<8x32xf32>
    %c0_12 = arith.constant 0 : index
    %c0_13 = arith.constant 0 : index
    %16 = vector.load %arg6[%c0_12, %c0_13] : memref<1x32xbf16, #tpu.memory_space<vmem>>, vector<1x32xbf16>
    %17 = arith.extf %16 : vector<1x32xbf16> to vector<1x32xf32>
    %18 = vector.broadcast %17 : vector<1x32xf32> to vector<8x32xf32>
    %19 = arith.mulf %15, %18 : vector<8x32xf32>
    %cst_14 = arith.constant dense<0.000000e+00> : vector<8xf32>
    %20 = vector.multi_reduction <add>, %19, %cst_14 [1] : vector<8x32xf32> to vector<8xf32>
    %21 = vector.shape_cast %20 : vector<8xf32> to vector<8x1xf32>
    %c0_15 = arith.constant 0 : index
    %c0_16 = arith.constant 0 : index
    %22 = memref.load %arg7[%c0_15, %c0_16] : memref<1x1xf32, #tpu.memory_space<smem>>
    %23 = vector.broadcast %22 : f32 to vector<8x1xf32>
    %24 = arith.addf %21, %23 : vector<8x1xf32>
    %25 = tpu.transpose %24, [1, 0] : vector<8x1xf32> -> vector<1x8xf32>
    %c0_17 = arith.constant 0 : index
    %c0_18 = arith.constant 0 : index
    %26 = vector.load %arg8[%c0_17, %c0_18] : memref<1x8xf32, #tpu.memory_space<vmem>>, vector<1x8xf32>
    tpu.vector_store %arg8[%c0_17, %c0_18], %25 {strides = array<i32>} : memref<1x8xf32, #tpu.memory_space<vmem>>, vector<1x8xf32>,
    return
  }
  func.func @transform_0(%arg0: i32) -> (i32, i32) {
    %c0_i32 = arith.constant 0 : i32
    %c0_i32_0 = arith.constant 0 : i32
    return %arg0, %c0_i32 : i32, i32
  }
  func.func @transform_1(%arg0: i32) -> (i32, i32) {
    %c0_i32 = arith.constant 0 : i32
    %c0_i32_0 = arith.constant 0 : i32
    %c0_i32_1 = arith.constant 0 : i32
    return %c0_i32, %c0_i32_0 : i32, i32
  }
  func.func @transform_2(%arg0: i32) -> (i32, i32) {
    %c0_i32 = arith.constant 0 : i32
    %c0_i32_0 = arith.constant 0 : i32
    %c0_i32_1 = arith.constant 0 : i32
    return %c0_i32, %c0_i32_0 : i32, i32
  }
  func.func @transform_3(%arg0: i32) -> (i32, i32) {
    %c0_i32 = arith.constant 0 : i32
    %c0_i32_0 = arith.constant 0 : i32
    %c0_i32_1 = arith.constant 0 : i32
    return %c0_i32, %c0_i32_0 : i32, i32
  }
  func.func @transform_4(%arg0: i32) -> (i32, i32) {
    %c0_i32 = arith.constant 0 : i32
    %c0_i32_0 = arith.constant 0 : i32
    %c0_i32_1 = arith.constant 0 : i32
    return %c0_i32, %c0_i32_0 : i32, i32
  }
  func.func @transform_5(%arg0: i32) -> (i32, i32) {
    %c0_i32 = arith.constant 0 : i32
    %c0_i32_0 = arith.constant 0 : i32
    %c0_i32_1 = arith.constant 0 : i32
    return %c0_i32, %c0_i32_0 : i32, i32
  }
  func.func @transform_6(%arg0: i32) -> (i32, i32) {
    %c0_i32 = arith.constant 0 : i32
    %c0_i32_0 = arith.constant 0 : i32
    %c0_i32_1 = arith.constant 0 : i32
    return %c0_i32, %c0_i32_0 : i32, i32
  }
  func.func @transform_7(%arg0: i32) -> (i32, i32) {
    %c0_i32 = arith.constant 0 : i32
    %c0_i32_0 = arith.constant 0 : i32
    return %c0_i32, %arg0 : i32, i32
  }
}

</mosaic_0001>

<bundles_post_ra>
// kernel: tpu_custom_call.1
= control target key start
LH: loop header
LB: loop body
LE: loop exit
PB: predicated region body
PF: predicated region fallthrough
CT: control target
= control target key end

     0   :  { %13 = vsyncpa [#allocation4], 0  ;;  %s508_s0 = inlined_call_operand.hbm [shape: bf16[8,16], index: 0, kind: input, shape index: {}]   ;;  %s509_s1 = inlined_call_operand.hbm [shape: bf16[16,32], index: 1, kind: input, shape index: {}]   ;;  %s510_s2 = inlined_call_operand.vmem [shape: f32[1,32], index: 2, kind: input, shape index: {}]   ;;  %s511_s3 = inlined_call_operand.hbm [shape: bf16[32,32], index: 3, kind: input, shape index: {}]   ;;  %s512_s4 = inlined_call_operand.vmem [shape: f32[1,32], index: 4, kind: input, shape index: {}]   ;;  %s513_s5 = inlined_call_operand.vmem [shape: bf16[1,32], index: 5, kind: input, shape index: {}]   ;;  %s514_s6 = inlined_call_operand.<no memory space> [shape: f32[1,1], index: 6, kind: input, shape index: {}]   ;;  %s515_s7 = inlined_call_operand.hbm [shape: f32[1,8], index: 7, kind: output, shape index: {}]  }
   0x1   :  { %14 = vsyncpa [#allocation7], 0 }
   0x2   :  { %15 = vsyncpa [#allocation5], 0  ;;  %s392_s24 = smov [#allocation6]   ;;  %s298_s28 = scalar_lea.hbm %s509_s1, 128 }
   0x3   :  { %s31_s25 = sshll.u32 %s392_s24, 4  ;;  %p299_p0 = scmp.ne.s32.totalorder %s509_s1, %s298_s28  ;;  %s32_s25 = int_to_ptr.vmem [resolvable:$true] %s31_s25 }
   0x4   :  { %p302_p1 = scmp.lt.u32.totalorder %s298_s28, %s509_s1 }
   0x6   :  { %p304_p2 = pnand %p302_p1, %p299_p0 }
   0x8   :  { %307 = shalt.err (!%p304_p2)
}
   0x9   :  { %s308_s10 = scalar_lea.vmem %s32_s25, 128  ;;  %p313_p4 = scmp.lt.s32.totalorder %s32_s25, %s32_s25 }
   0xa   :  { %p309_p3 = scmp.ne.s32.totalorder %s32_s25, %s308_s10  ;;  %p314_p5 = scmp.lt.s32.totalorder %s308_s10, %s308_s10 }
   0xc   :  { %p315_p6 = por %p314_p5, %p313_p4 }
   0xe   :  { %p316_p7 = pnand %p315_p6, %p309_p3 }
  0x10   :  { %319 = shalt.err (!%p316_p7)
}
  0x11   :  { %s393_s11 = smov 64   ;;  %s394_s12 = smov 4  }
  0x12   :  { %37 = dma.hbm_to_vmem [thread:$0]  %s509_s1, 128, %s32_s25, [#allocation7], %s393_s11, %s393_s11, %s394_s12  }
  0x13   :  { %s395_s15 = smov [#allocation3]   ;;  %s396_s17 = smov [#allocation8]  }
  0x14   :  { %s22_s16 = sshll.u32 %s395_s15, 4  ;;  %s45_s18 = sshll.u32 %s396_s17, 4  ;;  %s23_s16 = int_to_ptr.vmem [resolvable:$true] %s22_s16  ;;  %s46_s18 = int_to_ptr.vmem [resolvable:$true] %s45_s18 }
  0x15   :  { %s320_s21 = scalar_lea.hbm %s508_s0, 64 }
  0x16   :  { %p321_p8 = scmp.ne.s32.totalorder %s508_s0, %s320_s21  ;;  %p324_p9 = scmp.lt.u32.totalorder %s320_s21, %s508_s0 }
  0x18   :  { %p326_p10 = pnand %p324_p9, %p321_p8 }
  0x1a   :  { %329 = shalt.err (!%p326_p10)
}
  0x1b   :  { %s330_s1 = scalar_lea.vmem %s23_s16, 64  ;;  %p335_p12 = scmp.lt.s32.totalorder %s23_s16, %s23_s16 }
  0x1c   :  { %p331_p11 = scmp.ne.s32.totalorder %s23_s16, %s330_s1  ;;  %p336_p13 = scmp.lt.s32.totalorder %s330_s1, %s330_s1 }
  0x1e   :  { %p337_p0 = por %p336_p13, %p335_p12 }
  0x20   :  { %p338_p1 = pnand %p337_p0, %p331_p11 }
  0x22   :  { %341 = shalt.err (!%p338_p1)
}
  0x23   :  { %25 = dma.hbm_to_vmem [thread:$0]  %s508_s0, 64, %s23_s16, [#allocation4]  }
  0x24   :  { %s342_s30 = scalar_lea.hbm %s511_s3, 256 }
  0x25   :  { %p343_p2 = scmp.ne.s32.totalorder %s511_s3, %s342_s30  ;;  %p346_p3 = scmp.lt.u32.totalorder %s342_s30, %s511_s3 }
  0x27   :  { %p348_p4 = pnand %p346_p3, %p343_p2 }
  0x29   :  { %351 = shalt.err (!%p348_p4)
}
  0x2a   :  { %s352_s14 = scalar_lea.vmem %s46_s18, 256  ;;  %p357_p6 = scmp.lt.s32.totalorder %s46_s18, %s46_s18 }
  0x2b   :  { %p353_p5 = scmp.ne.s32.totalorder %s46_s18, %s352_s14  ;;  %p358_p7 = scmp.lt.s32.totalorder %s352_s14, %s352_s14 }
  0x2d   :  { %p359_p8 = por %p358_p7, %p357_p6 }
  0x2f   :  { %p360_p9 = pnand %p359_p8, %p353_p5 }
  0x31   :  { %363 = shalt.err (!%p360_p9)
}
  0x32   :  { %51 = dma.hbm_to_vmem [thread:$0]  %s511_s3, 256, %s46_s18, [#allocation7], %s393_s11, %s393_s11, %s394_s12  }
  0x33   :  { %386 = dma.done.wait [#allocation4], 64  }
  0x34   :  { %387 = vsyncadd [#allocation4], 4294967232 }
  0x35   :  { %388 = dma.done.wait [#allocation7], 384  }
  0x36   :  { %389 = vsyncadd [#allocation7], 4294966912  ;;  %v397_v0 = vmov 0.0   ;;  %vm398_vm0 = vmmov 0   ;;  %v295_v1 = vld [vmem:[#allocation6] sm:$0xff]   ;;  %vm84_vm1 = vcmask 130048   ;;  %v200_v13 = vlaneseq }
  0x37   :  { %273 = vmatprep.subr.bf16.mxu0 %v397_v0  ;;  %275 = vmatprep.mubr.msk.bf16.mxu0 %vm398_vm0, %v397_v0  ;;  %v68_v2 = vld [vmem:[#allocation3] sm:$0xf]  ;;  %v296_v3 = vld [vmem:[#allocation8] sm:$0xff]   ;;  %v297_v4 = vld [vmem:[#allocation8 + $0x8] sm:$0xff]   ;;  %vm153_vm2 = vcmask 261120   ;;  %v209_v28 = vstv %s514_s6  ;;  %vm243_vm3 = vcmask 57344  }
  0x38   :  { %279 = vmatprep.subr.bf16.mxu1 %v397_v0  ;;  %283 = vmatprep.mubr.msk.bf16.mxu1 %vm398_vm0, %v397_v0  ;;  %v261_v5 = vld [vmem:[%s510_s2] ss:$0 sm:$0xff]  ;;  %v201_v14 = vshrl.u32 %v200_v13, 7 }
  0x39   :  { %274 = vmatpush3.bf16.msra.mxu0 %v295_v1  ;;  %280 = vmatpush3.bf16.msra.mxu1 %v296_v3  ;;  %v198_v15 = vld [vmem:[%s513_s5] sm:$0x1]  ;;  %s399_s5 = smov [#allocation9]  }
  0x3a   :  { %281 = vmatprep.subr.bf16.mxu1 %v397_v0  ;;  %v199_v16 = vunpack.c.l.bf16 %v198_v15  ;;  %v202_v17 = vsub.s32 0, %v201_v14  ;;  %v264_v18 = vld [vmem:[%s512_s4] ss:$0 sm:$0xff]  ;;  %s251_s4 = sshll.u32 %s399_s5, 4  ;;  %s252_s4 = int_to_ptr.vmem [resolvable:$true] %s251_s4 }
  0x3b   :  { %s364_s20 = scalar_lea.vmem %s252_s4, 16  ;;  %s368_s21 = scalar_lea.vmem %s252_s4, 32 }
  0x3c   :  { %276 = vmatmul.mubr.msk.bf16.vlgmr.msra.gmra.mrb[0].mxu0 %vm84_vm1, %v68_v2  ;;  %v203_v22 = vrot.slane %v199_v16, %v202_v17  ;;  %p365_p10 = scmp.ne.s32.totalorder %s252_s4, %s364_s20  ;;  %p369_p11 = scmp.lt.s32.totalorder %s252_s4, %s252_s4 }
  0x3d   :  { %282 = vmatpush3.bf16.msra.mxu1 %v297_v4  ;;  %p370_p12 = scmp.lt.s32.totalorder %s368_s21, %s364_s20 }
  0x3f   :  { %p371_p13 = por %p370_p12, %p369_p11 }
  0x41   :  { %p372_p0 = pnand %p371_p13, %p365_p10 }
 0x10f   :  { %v122_v6 = vpop.f32.mrb[0].mxu0 }
 0x110   :  { %v123_v7 = vadd.f32 %v261_v5, %v122_v6  ;;  %v277_v8 = vpop.f32.mrb[1].mxu0 }
 0x111   :  { %v125_v9 = vpop.f32.mrb[2].mxu0 }
 0x112   :  { %v128_v10 = vmax.f32 %v123_v7, 0.0  ;;  %v278_v11 = vpop.f32.mrb[3].mxu0 }
 0x114   :  { %v129_v12 = vpack.c.bf16 %v128_v10, %v128_v10 }
 0x116   :  { %284 = vmatmul.mubr.msk.bf16.vlgmr.msra.gmra.mrb[0].mxu1 %vm153_vm2, %v129_v12 }
 0x1e9   :  { %v191_v19 = vpop.f32.mrb[0].mxu1 }
 0x1ea   :  { %v192_v20 = vadd.f32 %v264_v18, %v191_v19  ;;  %v285_v21 = vpop.f32.mrb[1].mxu1 }
 0x1eb   :  { %v194_v23 = vpop.f32.mrb[2].mxu1 }
 0x1ec   :  { %v197_v24 = vmax.f32 %v192_v20, 0.0  ;;  %v286_v25 = vpop.f32.mrb[3].mxu1 }
 0x1ee   :  { %v204_v26 = vmul.f32 %v203_v22, %v197_v24 }
 0x1f0   :  { %v205_v27 = vsel %vm153_vm2, %v204_v26, 0.0 }
 0x1f1   :  { %206 = vadd.xlane.f32.xlu0 %v205_v27 }
 0x27e   :  { %v207_v29 = vpop.xlane.xlu0 %206 }
 0x27f   :  { %v210_v30 = vadd.f32 %v209_v28, %v207_v29 }
 0x281   :  { %211 = vxpose.xlu0.b32.start.end [1/1] (short) (narrow) %v210_v30, 8 }
 0x301   :  { %v227_v31 = vpop.trf.xlu0 }
 0x302   :  { %244 = vst.msk [vmem:[#allocation9] sm:$0x1] %vm243_vm3, %v227_v31 }
 0x303   :  { %375 = shalt.err (!%p372_p0)
}
 0x304   :  { %s376_s6 = scalar_lea.hbm %s515_s7, 16 }
 0x305   :  { %p377_p1 = scmp.ne.s32.totalorder %s515_s7, %s376_s6  ;;  %p380_p2 = scmp.lt.u32.totalorder %s376_s6, %s515_s7 }
 0x307   :  { %p382_p3 = pnand %p380_p2, %p377_p1 }
 0x309   :  { %385 = shalt.err (!%p382_p3)
}
 0x30a   :  { %254 = dma.vmem_to_hbm [thread:$0]  %s252_s4, 16, %s515_s7, [#allocation5]  }
 0x30b   :  { %390 = dma.done.wait [#allocation5], 16  }
 0x30c   :  { %391 = vsyncadd [#allocation5], 4294967280 }
 0x30d   :  { %258 = vsyncpa [#allocation4], 1 }
 0x30e   :  { %259 = vsyncpa [#allocation7], 1 }
 0x30f   :  { %260 = vsyncpa [#allocation5], 1 }

</bundles_post_ra>
